<compile_context>
chip_gen: v6e
topology: v6e:2x2x1
jax: 0.10.0
libtpu: 0.0.40
codegen_flags: <defaults>
</compile_context>

<pallas_src>
import math

import jax
import jax.numpy as jnp
from jax.experimental import pallas as pl
from jax.experimental.pallas import tpu as pltpu


# --------------------------------------------------------------------------
# Kernels
# --------------------------------------------------------------------------

def _ffn_resident_kernel(x_ref, w1t_ref, b1_ref, w2t_ref, b2_ref, o_ref):
    """Weights fully resident in VMEM; one row tile per grid step."""
    h = jnp.dot(x_ref[...], w1t_ref[...], preferred_element_type=jnp.float32)
    h = jnp.maximum(h + b1_ref[...], jnp.float32(0.0))         # ReLU
    # TODO(synk): dropout(h) for training mode not implemented (identity).
    o = jnp.dot(h.astype(w2t_ref.dtype), w2t_ref[...],
                preferred_element_type=jnp.float32)
    o_ref[...] = (o + b2_ref[...]).astype(o_ref.dtype)


def _ffn_streamed_kernel(x_ref, w1t_ref, b1_ref, w2t_ref, b2_ref, o_ref,
                         acc_ref):
    """d_ff streamed in tiles; f32 accumulator carried across the reduction."""
    j = pl.program_id(1)                        # d_ff tile index ("arbitrary")

    @pl.when(j == 0)
    def _():
        # Seed the accumulator with b2 -> no bias add in the epilogue.
        acc_ref[...] = jnp.broadcast_to(b2_ref[...], acc_ref.shape)

    h = jnp.dot(x_ref[...], w1t_ref[...], preferred_element_type=jnp.float32)
    h = jnp.maximum(h + b1_ref[...], jnp.float32(0.0))          # ReLU
    # TODO(synk): dropout(h) for training mode not implemented (identity).
    acc_ref[...] += jnp.dot(h.astype(w2t_ref.dtype), w2t_ref[...],
                            preferred_element_type=jnp.float32)

    @pl.when(j == pl.num_programs(1) - 1)
    def _():
        o_ref[...] = acc_ref[...].astype(o_ref.dtype)


# --------------------------------------------------------------------------
# Parameter preparation (do ONCE per set of weights, not per forward call)
# --------------------------------------------------------------------------

def prepare_ffn_params(w1, b1, w2, b2, *, compute_dtype=jnp.bfloat16):
    """Fold nn.Linear transposes and cast weights to the MXU compute dtype.

    w1: (d_ff, d_model), b1: (d_ff,)     -- nn.Linear(d_model, d_ff)
    w2: (d_model, d_ff), b2: (d_model,)  -- nn.Linear(d_ff, d_model)
    """
    cd = jnp.dtype(compute_dtype) if compute_dtype is not None else jnp.dtype(w1.dtype)
    return dict(
        w1t=jnp.asarray(w1).T.astype(cd),                   # (d_model, d_ff)
        w2t=jnp.asarray(w2).T.astype(cd),                   # (d_ff, d_model)
        b1=jnp.asarray(b1).reshape(1, -1).astype(jnp.float32),   # (1, d_ff)
        b2=jnp.asarray(b2).reshape(1, -1).astype(jnp.float32),   # (1, d_model)
        compute_dtype=cd,
    )


# --------------------------------------------------------------------------
# Tile selection helpers
# --------------------------------------------------------------------------

def _pick_row_tile(M, block_m, align):
    if M <= block_m:
        return M                                  # single full-extent tile
    t = (min(block_m, M) // align) * align
    while t >= align:
        if M % t == 0:
            return t
        t -= align
    return M                                      # fallback: one big tile


def _pick_ff_tile(d_ff, block_ff):
    if d_ff <= block_ff:
        return d_ff
    t = (min(block_ff, d_ff) // 128) * 128
    while t >= 128:
        if d_ff % t == 0:
            return t
        t -= 128
    return d_ff


# --------------------------------------------------------------------------
# Forward wrapper
# --------------------------------------------------------------------------

_RESIDENT_VMEM_BUDGET = 28 << 20      # conservative: fits v7x's smaller VMEM
_VMEM_LIMIT_CAP = 64 << 20            # <= physical VMEM on v5e/v6e/v7x


def feed_forward(x, params, *, block_m=256, block_ff=1024, mode=None):
    """FeedForwardBlock forward (inference).  `params` from prepare_ffn_params."""
    w1t, b1, w2t, b2 = params["w1t"], params["b1"], params["w2t"], params["b2"]
    cd = params["compute_dtype"]

    orig_shape = x.shape
    d_model = orig_shape[-1]
    d_ff = w1t.shape[1]
    M = math.prod(orig_shape[:-1])

    xf = x.reshape(M, d_model)
    if xf.dtype != cd:
        xf = xf.astype(cd)

    itemsize = jnp.dtype(cd).itemsize
    out_itemsize = jnp.dtype(x.dtype).itemsize
    align = 16 if itemsize == 2 else 8            # bf16 packs 16 rows / vreg
    tm = _pick_row_tile(M, block_m, align)
    n_row_tiles = M // tm

    # ---- mode selection: resident weights if they (plus hidden) fit in VMEM.
    if mode is None:
        resident_est = (w1t.nbytes + w2t.nbytes + b1.nbytes + b2.nbytes
                        + 2 * tm * d_model * itemsize          # x tiles (dbl buf)
                        + 2 * tm * d_model * out_itemsize      # out tiles
                        + tm * d_ff * 4)                       # f32 hidden
        mode = "resident" if resident_est <= _RESIDENT_VMEM_BUDGET else "streamed"

    flops = 4 * M * d_model * d_ff                 # two matmuls

    if mode == "resident":
        est = (w1t.nbytes + w2t.nbytes + b1.nbytes + b2.nbytes
               + 2 * tm * d_model * itemsize
               + 2 * tm * d_model * out_itemsize
               + tm * d_ff * 4)
        bytes_accessed = (xf.nbytes + w1t.nbytes + w2t.nbytes + b1.nbytes
                          + b2.nbytes + M * d_model * out_itemsize)
        vmem_limit = int(min(max(2 * est, 32 << 20), _VMEM_LIMIT_CAP))

        out = pl.pallas_call(
            _ffn_resident_kernel,
            out_shape=jax.ShapeDtypeStruct((M, d_model), x.dtype),
            grid_spec=pltpu.PrefetchScalarGridSpec(
                num_scalar_prefetch=0,
                grid=(n_row_tiles,),
                in_specs=[
                    pl.BlockSpec((tm, d_model), lambda i: (i, 0)),    # x rows
                    pl.BlockSpec((d_model, d_ff), lambda i: (0, 0)),  # W1^T (resident)
                    pl.BlockSpec((1, d_ff), lambda i: (0, 0)),        # b1
                    pl.BlockSpec((d_ff, d_model), lambda i: (0, 0)),  # W2^T (resident)
                    pl.BlockSpec((1, d_model), lambda i: (0, 0)),     # b2
                ],
                out_specs=pl.BlockSpec((tm, d_model), lambda i: (i, 0)),
            ),
            compiler_params=pltpu.CompilerParams(
                dimension_semantics=("parallel",),
                vmem_limit_bytes=vmem_limit),
            cost_estimate=pl.CostEstimate(flops=flops, transcendentals=0,
                                          bytes_accessed=int(bytes_accessed)),
        )(xf, w1t, b1, w2t, b2)

    else:  # streamed reduction over d_ff tiles
        tff = _pick_ff_tile(d_ff, block_ff)
        n_ff_tiles = d_ff // tff

        est = (2 * tm * d_model * itemsize            # x tiles
               + 2 * d_model * tff * itemsize         # W1^T tiles
               + 2 * tff * d_model * itemsize         # W2^T tiles
               + 2 * tff * 4 + 2 * d_model * 4        # bias tiles (f32)
               + 2 * tm * d_model * out_itemsize      # out tiles
               + tm * d_model * 4                     # f32 accumulator
               + tm * tff * 4)                        # f32 hidden
        bytes_accessed = (xf.nbytes + M * d_model * out_itemsize + b2.nbytes
                          + n_row_tiles * (w1t.nbytes + w2t.nbytes + b1.nbytes))
        vmem_limit = int(min(max(2 * est, 32 << 20), _VMEM_LIMIT_CAP))

        out = pl.pallas_call(
            _ffn_streamed_kernel,
            out_shape=jax.ShapeDtypeStruct((M, d_model), x.dtype),
            grid_spec=pltpu.PrefetchScalarGridSpec(
                num_scalar_prefetch=0,
                grid=(n_row_tiles, n_ff_tiles),
                in_specs=[
                    pl.BlockSpec((tm, d_model), lambda i, j: (i, 0)),   # x rows
                    pl.BlockSpec((d_model, tff), lambda i, j: (0, j)),  # W1^T tile
                    pl.BlockSpec((1, tff), lambda i, j: (0, j)),        # b1 tile
                    pl.BlockSpec((tff, d_model), lambda i, j: (j, 0)),  # W2^T tile
                    pl.BlockSpec((1, d_model), lambda i, j: (0, 0)),    # b2
                ],
                out_specs=pl.BlockSpec((tm, d_model), lambda i, j: (i, 0)),
                scratch_shapes=[pltpu.VMEM((tm, d_model), jnp.float32)],
            ),
            compiler_params=pltpu.CompilerParams(
                dimension_semantics=("parallel", "arbitrary"),
                vmem_limit_bytes=vmem_limit),
            cost_estimate=pl.CostEstimate(flops=flops, transcendentals=0,
                                          bytes_accessed=int(bytes_accessed)),
        )(xf, w1t, b1, w2t, b2)

    return out.reshape(orig_shape)


# --------------------------------------------------------------------------
# Reference + self-test
# --------------------------------------------------------------------------

def feed_forward_reference(x, w1, b1, w2, b2):
    """Plain-JAX replica of the PyTorch forward (dropout = identity)."""
    h = jnp.maximum(x @ w1.T + b1, 0.0)
    return h @ w2.T + b2


if __name__ == "__main__":
    B, S, D_MODEL, D_FF = 2, 8, 32, 256

    key = jax.random.PRNGKey(0)
    kx, kw1, kb1, kw2, kb2 = jax.random.split(key, 5)

    x = jax.random.normal(kx, (B, S, D_MODEL), dtype=jnp.float32)
    w1 = 0.05 * jax.random.normal(kw1, (D_FF, D_MODEL), dtype=jnp.float32)
    b1 = 0.05 * jax.random.normal(kb1, (D_FF,), dtype=jnp.float32)
    w2 = 0.05 * jax.random.normal(kw2, (D_MODEL, D_FF), dtype=jnp.float32)
    b2 = 0.05 * jax.random.normal(kb2, (D_MODEL,), dtype=jnp.float32)

    ref = feed_forward_reference(x, w1, b1, w2, b2)

    # 1) Default path: bf16 MXU compute, resident weights (single HBM pass).
    params_bf16 = prepare_ffn_params(w1, b1, w2, b2)          # bf16 by default
    out_bf16 = jax.block_until_ready(feed_forward(x, params_bf16))
    assert out_bf16.shape == x.shape
    assert jnp.allclose(out_bf16, ref, rtol=2e-2, atol=2e-2), "bf16 path mismatch"

    # 2) f32 path, forced streamed mode (exercises accumulator kernel), tight tol.
    params_f32 = prepare_ffn_params(w1, b1, w2, b2, compute_dtype=jnp.float32)
    out_f32 = jax.block_until_ready(
        feed_forward(x, params_f32, block_m=8, block_ff=128, mode="streamed"))
    assert out_f32.shape == x.shape
    assert jnp.allclose(out_f32, ref, rtol=1e-4, atol=1e-4), "f32 path mismatch"

    print("KERNEL_OK")
</pallas_src>

<mosaic_0001>
module attributes {stable_mosaic.version = 11 : i64} {
  func.func @_ffn_resident_kernel(%arg0: i32, %arg1: memref<16x32xbf16, #tpu.memory_space<vmem>>, %arg2: memref<32x256xbf16, #tpu.memory_space<vmem>>, %arg3: memref<1x256xf32, #tpu.memory_space<vmem>>, %arg4: memref<256x32xbf16, #tpu.memory_space<vmem>>, %arg5: memref<1x32xf32, #tpu.memory_space<vmem>>, %arg6: memref<16x32xf32, #tpu.memory_space<vmem>>) attributes {dimension_semantics = [#tpu.dimension_semantics<parallel>], iteration_bounds = array<i64: 1>, scalar_prefetch = 0 : i64, scratch_operands = 0 : i64, tpu.core_type = #tpu.core_type<tc>, window_params = [{transform_indices = @transform_0, window_bounds = array<i64: 16, 32>}, {pipeline_mode = #tpu.pipeline_mode<synchronous>, transform_indices = @transform_1, window_bounds = array<i64: 32, 256>}, {pipeline_mode = #tpu.pipeline_mode<synchronous>, transform_indices = @transform_2, window_bounds = array<i64: 1, 256>}, {pipeline_mode = #tpu.pipeline_mode<synchronous>, transform_indices = @transform_3, window_bounds = array<i64: 256, 32>}, {pipeline_mode = #tpu.pipeline_mode<synchronous>, transform_indices = @transform_4, window_bounds = array<i64: 1, 32>}, {transform_indices = @transform_5, window_bounds = array<i64: 16, 32>}]} {
    %c0 = arith.constant 0 : index
    %c0_0 = arith.constant 0 : index
    %0 = vector.load %arg1[%c0, %c0_0] : memref<16x32xbf16, #tpu.memory_space<vmem>>, vector<16x32xbf16>
    %c0_1 = arith.constant 0 : index
    %c0_2 = arith.constant 0 : index
    %1 = vector.load %arg2[%c0_1, %c0_2] : memref<32x256xbf16, #tpu.memory_space<vmem>>, vector<32x256xbf16>
    %cst = arith.constant dense<0.000000e+00> : vector<16x256xf32>
    %2 = tpu.matmul %0, %1, %cst {dimension_numbers = #tpu.dot_dimension_numbers<[1], [0], [0], [1], [0, 0, 1, 1], [], []>} : vector<16x32xbf16>, vector<32x256xbf16>, vector<16x256xf32> -> vector<16x256xf32>
    %c0_3 = arith.constant 0 : index
    %c0_4 = arith.constant 0 : index
    %3 = vector.load %arg3[%c0_3, %c0_4] : memref<1x256xf32, #tpu.memory_space<vmem>>, vector<1x256xf32>
    %4 = vector.broadcast %3 : vector<1x256xf32> to vector<16x256xf32>
    %5 = arith.addf %2, %4 : vector<16x256xf32>
    %cst_5 = arith.constant 0.000000e+00 : f32
    %6 = vector.broadcast %cst_5 : f32 to vector<16x256xf32>
    %7 = arith.maximumf %5, %6 : vector<16x256xf32>
    %8 = arith.truncf %7 : vector<16x256xf32> to vector<16x256xbf16>
    %c0_6 = arith.constant 0 : index
    %c0_7 = arith.constant 0 : index
    %9 = vector.load %arg4[%c0_6, %c0_7] : memref<256x32xbf16, #tpu.memory_space<vmem>>, vector<256x32xbf16>
    %cst_8 = arith.constant dense<0.000000e+00> : vector<16x32xf32>
    %10 = tpu.matmul %8, %9, %cst_8 {dimension_numbers = #tpu.dot_dimension_numbers<[1], [0], [0], [1], [0, 0, 1, 1], [], []>} : vector<16x256xbf16>, vector<256x32xbf16>, vector<16x32xf32> -> vector<16x32xf32>
    %c0_9 = arith.constant 0 : index
    %c0_10 = arith.constant 0 : index
    %11 = vector.load %arg5[%c0_9, %c0_10] : memref<1x32xf32, #tpu.memory_space<vmem>>, vector<1x32xf32>
    %12 = vector.broadcast %11 : vector<1x32xf32> to vector<16x32xf32>
    %13 = arith.addf %10, %12 : vector<16x32xf32>
    %c0_11 = arith.constant 0 : index
    %c0_12 = arith.constant 0 : index
    %14 = vector.load %arg6[%c0_11, %c0_12] : memref<16x32xf32, #tpu.memory_space<vmem>>, vector<16x32xf32>
    tpu.vector_store %arg6[%c0_11, %c0_12], %13 {strides = array<i32>} : memref<16x32xf32, #tpu.memory_space<vmem>>, vector<16x32xf32>,
    return
  }
  func.func @transform_0(%arg0: i32) -> (i32, i32) {
    %c0_i32 = arith.constant 0 : i32
    %c0_i32_0 = arith.constant 0 : i32
    return %arg0, %c0_i32 : i32, i32
  }
  func.func @transform_1(%arg0: i32) -> (i32, i32) {
    %c0_i32 = arith.constant 0 : i32
    %c0_i32_0 = arith.constant 0 : i32
    %c0_i32_1 = arith.constant 0 : i32
    return %c0_i32, %c0_i32_0 : i32, i32
  }
  func.func @transform_2(%arg0: i32) -> (i32, i32) {
    %c0_i32 = arith.constant 0 : i32
    %c0_i32_0 = arith.constant 0 : i32
    %c0_i32_1 = arith.constant 0 : i32
    return %c0_i32, %c0_i32_0 : i32, i32
  }
  func.func @transform_3(%arg0: i32) -> (i32, i32) {
    %c0_i32 = arith.constant 0 : i32
    %c0_i32_0 = arith.constant 0 : i32
    %c0_i32_1 = arith.constant 0 : i32
    return %c0_i32, %c0_i32_0 : i32, i32
  }
  func.func @transform_4(%arg0: i32) -> (i32, i32) {
    %c0_i32 = arith.constant 0 : i32
    %c0_i32_0 = arith.constant 0 : i32
    %c0_i32_1 = arith.constant 0 : i32
    return %c0_i32, %c0_i32_0 : i32, i32
  }
  func.func @transform_5(%arg0: i32) -> (i32, i32) {
    %c0_i32 = arith.constant 0 : i32
    %c0_i32_0 = arith.constant 0 : i32
    return %arg0, %c0_i32 : i32, i32
  }
}

</mosaic_0001>

<bundles_post_ra>
// kernel: tpu_custom_call.1
= control target key start
LH: loop header
LB: loop body
LE: loop exit
PB: predicated region body
PF: predicated region fallthrough
CT: control target
= control target key end

     0   :  { %v406_v2 = vmov 0   ;;  %vm65_vm0 = vcmask 261120   ;;  %s515_s0 = inlined_call_operand.vmem [shape: bf16[16,32], index: 0, kind: input, shape index: {}]   ;;  %s516_s1 = inlined_call_operand.vmem [shape: bf16[32,256], index: 1, kind: input, shape index: {}]   ;;  %s517_s2 = inlined_call_operand.vmem [shape: f32[1,256], index: 2, kind: input, shape index: {}]   ;;  %s518_s3 = inlined_call_operand.vmem [shape: bf16[256,32], index: 3, kind: input, shape index: {}]   ;;  %s519_s4 = inlined_call_operand.vmem [shape: f32[1,32], index: 4, kind: input, shape index: {}]   ;;  %s520_s5 = inlined_call_operand.hbm [shape: f32[16,32], index: 5, kind: output, shape index: {}]  }
   0x1   :  { %v361_v0 = vld [vmem:[%s516_s1 + $0x14] ss:$8 sps:$4 sm:$0xff]   ;;  %v363_v1 = vld [vmem:[%s516_s1 + $0x10] ss:$8 sps:$4 sm:$0xff]   ;;  %101 = vmatprep.mubr.bf16.mxu0 %v406_v2  ;;  %v364_v3 = vld [vmem:[%s516_s1 + $0x4] ss:$8 sps:$4 sm:$0xff]  }
   0x2   :  { %81 = vmatprep.subr.bf16.mxu0 %v361_v0  ;;  %v366_v4 = vld [vmem:[%s516_s1] ss:$8 sps:$4 sm:$0xff]   ;;  %v368_v6 = vld [vmem:[%s518_s3 + $0x78] sm:$0xff]   ;;  %v370_v8 = vld [vmem:[%s518_s3 + $0x70] sm:$0xff]  }
   0x3   :  { %82 = vmatpush1.bf16.msra.mxu0 %v363_v1  ;;  %v367_v5 = vld [vmem:[%s515_s0] sm:$0xff]   ;;  %v369_v7 = vld [vmem:[%s518_s3 + $0x38] sm:$0xff]   ;;  %335 = vmatprep.subr.bf16.mxu1 %v368_v6  ;;  %v371_v9 = vld [vmem:[%s518_s3 + $0x30] sm:$0xff]  }
   0x4   :  { %83 = vmatprep.subr.bf16.mxu0 %v364_v3  ;;  %336 = vmatpush3.bf16.msra.mxu1 %v369_v7  ;;  %v372_v10 = vld [vmem:[%s518_s3 + $0x68] sm:$0xff]   ;;  %v374_v12 = vld [vmem:[%s518_s3 + $0x60] sm:$0xff]   ;;  %v376_v14 = vld [vmem:[%s518_s3 + $0x58] sm:$0xff]  }
   0x5   :  { %337 = vmatprep.subr.bf16.mxu1 %v370_v8  ;;  %v373_v11 = vld [vmem:[%s518_s3 + $0x28] sm:$0xff]   ;;  %v375_v13 = vld [vmem:[%s518_s3 + $0x20] sm:$0xff]  }
   0x7   :  { %84 = vmatpush1.bf16.msra.mxu0 %v366_v4 }
   0x8   :  { %338 = vmatpush3.bf16.msra.mxu1 %v371_v9 }
   0x9   :  { %339 = vmatprep.subr.bf16.mxu1 %v372_v10 }
   0xa   :  { %317 = vmatmul.mubr.msk.bf16.vlgmr.msra.gmra.mxu0 %vm65_vm0, %v367_v5 }
   0xc   :  { %340 = vmatpush3.bf16.msra.mxu1 %v373_v11 }
   0xd   :  { %341 = vmatprep.subr.bf16.mxu1 %v374_v12 }
   0xe   :  { %10 = vsyncpa [#allocation3], 0  ;;  %v377_v15 = vld [vmem:[%s518_s3 + $0x18] sm:$0xff]   ;;  %v378_v16 = vld [vmem:[%s518_s3 + $0x50] sm:$0xff]   ;;  %v30_v22 = vlaneseq  ;;  %s407_s9 = smov [#allocation2]  }
   0xf   :  { %v379_v17 = vld [vmem:[%s518_s3 + $0x10] sm:$0xff]   ;;  %v380_v18 = vld [vmem:[%s518_s3 + $0x48] sm:$0xff]   ;;  %v382_v20 = vld [vmem:[%s518_s3 + $0x40] sm:$0xff]   ;;  %s301_s0 = sshll.u32 %s407_s9, 4  ;;  %s302_s0 = int_to_ptr.vmem [resolvable:$true] %s301_s0 }
  0x10   :  { %342 = vmatpush3.bf16.msra.mxu1 %v375_v13  ;;  %v381_v19 = vld [vmem:[%s518_s3 + $0x8] sm:$0xff]   ;;  %v383_v21 = vld [vmem:[%s518_s3] sm:$0xff]   ;;  %v31_v23 = vshrl.u32 %v30_v22, 7  ;;  %s384_s10 = scalar_lea.vmem %s302_s0, 256  ;;  %p389_p1 = scmp.lt.s32.totalorder %s302_s0, %s302_s0 }
  0x11   :  { %343 = vmatprep.subr.bf16.mxu1 %v376_v14  ;;  %v28_v26 = vld [vmem:[%s517_s2] sm:$0x3]  ;;  %p385_p0 = scmp.ne.s32.totalorder %s302_s0, %s384_s10  ;;  %p390_p2 = scmp.lt.s32.totalorder %s384_s10, %s384_s10 }
  0x12   :  { %v36_v24 = vsub.s32 1, %v31_v23  ;;  %v32_v25 = vsub.s32 0, %v31_v23  ;;  %v318_v44 = vld [vmem:[%s519_s4] ss:$0 sm:$0xff] }
  0x13   :  { %p391_p3 = por %p390_p2, %p389_p1 }
  0x14   :  { %344 = vmatpush3.bf16.msra.mxu1 %v377_v15  ;;  %v37_v28 = vrot.slane %v28_v26, %v36_v24  ;;  %v33_v29 = vrot.slane %v28_v26, %v32_v25 }
  0x15   :  { %345 = vmatprep.subr.bf16.mxu1 %v378_v16  ;;  %p392_p4 = pnand %p391_p3, %p385_p0 }
  0x18   :  { %346 = vmatpush3.bf16.msra.mxu1 %v379_v17 }
  0x19   :  { %347 = vmatprep.subr.bf16.mxu1 %v380_v18 }
  0x1c   :  { %348 = vmatpush3.bf16.msra.mxu1 %v381_v19 }
  0x1d   :  { %349 = vmatprep.subr.bf16.mxu1 %v382_v20 }
  0x20   :  { %350 = vmatpush3.bf16.msra.mxu1 %v383_v21 }
  0xca   :  { %v103_v27 = vpop.f32.mrf.mxu0 }
  0xcb   :  { %v104_v34 = vadd.f32 %v103_v27, %v33_v29 }
  0xcc   :  { %v105_v30 = vpop.f32.mrf.mxu0 }
  0xcd   :  { %v106_v32 = vadd.f32 %v105_v30, %v37_v28  ;;  %v112_v40 = vmax.f32 %v104_v34, 0.0 }
  0xce   :  { %v107_v31 = vpop.f32.mrf.mxu0 }
  0xcf   :  { %v108_v33 = vadd.f32 %v107_v31, %v33_v29  ;;  %v113_v38 = vmax.f32 %v106_v32, 0.0 }
  0xd0   :  { %v109_v35 = vpop.f32.mrf.mxu0 }
  0xd1   :  { %v110_v36 = vadd.f32 %v109_v35, %v37_v28  ;;  %v114_v37 = vmax.f32 %v108_v33, 0.0 }
  0xd3   :  { %v115_v39 = vmax.f32 %v110_v36, 0.0  ;;  %v116_v42 = vpack.c.bf16 %v114_v37, %v112_v40 }
  0xd5   :  { %v117_v41 = vpack.c.bf16 %v115_v39, %v113_v38 }
  0xd7   :  { %285 = vmatprep.mubr.bf16.mxu1 %v117_v41 }
  0xd8   :  { %286 = vmatmul.mubr.bf16.vlgmr.msra.gmra.mxu1 %v116_v42 }
 0x198   :  { %v351_v43 = vpop.f32.mrf.mxu1 }
 0x19a   :  { %v352_v45 = vpop.f32.mrf.mxu1 }
 0x19b   :  { %v353_v46 = vadd.f32 %v352_v45, %v351_v43 }
 0x19c   :  { %v354_v47 = vpop.f32.mrf.mxu1 }
 0x19d   :  { %v288_v48 = vadd.f32 %v353_v46, %v318_v44 }
 0x19e   :  { %v355_v49 = vpop.f32.mrf.mxu1 }
 0x19f   :  { %294 = vst.msk [vmem:[#allocation2] sm:$0xff] %vm65_vm0, %v288_v48  ;;  %v356_v50 = vadd.f32 %v355_v49, %v354_v47 }
 0x1a1   :  { %v291_v51 = vadd.f32 %v356_v50, %v318_v44 }
 0x1a3   :  { %295 = vst.msk [vmem:[#allocation2 + $0x8] sm:$0xff] %vm65_vm0, %v291_v51 }
 0x1a4   :  { %395 = shalt.err (!%p392_p4)
}
 0x1a5   :  { %s408_s4 = smov 128   ;;  %s409_s11 = smov 8  }
 0x1a6   :  { %307 = dma.vmem_to_hbm [thread:$0]  %s302_s0, 256, %s520_s5, [#allocation3], %s408_s4, %s408_s4, %s409_s11  }
 0x1a7   :  { %404 = dma.done.wait [#allocation3], 256  }
 0x1a8   :  { %405 = vsyncadd [#allocation3], 4294967040 }
 0x1a9   :  { %311 = vsyncpa [#allocation3], 1 }

</bundles_post_ra>
